<compile_context>
chip_gen: v5e
topology: v5e:2x2
jax: 0.10.0
libtpu: 0.0.40
codegen_flags: <defaults>
</compile_context>

<pallas_src>
import functools

import jax
import jax.numpy as jnp
from jax.experimental import pallas as pl
from jax.experimental.pallas import tpu as pltpu


def _round_up(x: int, m: int) -> int:
    return (x + m - 1) // m * m


def _dqn_kernel(x_ref, w1_ref, b1_ref, w2_ref, b2_ref, out_ref):
    """Fused MLP forward on one batch tile: out = relu(x @ w1 + b1) @ w2 + b2.

    x_ref  : (TB, OBS)        f32   (tiled over batch)
    w1_ref : (OBS, HIDDEN)    bf16  (resident across grid steps)
    b1_ref : (1, HIDDEN)      f32
    w2_ref : (HIDDEN, ACT)    bf16  (resident across grid steps)
    b2_ref : (1, ACT)         f32
    out_ref: (TB, ACT)        f32
    """
    # Layer 1: cast x to bf16 in-registers, bf16 MXU matmul, f32 accumulate.
    x = x_ref[...].astype(jnp.bfloat16)
    h = jnp.dot(x, w1_ref[...], preferred_element_type=jnp.float32)
    # Bias add + ReLU on the VPU in f32 (no bf16 VALU on v5e).
    h = jnp.maximum(h + b1_ref[...], 0.0)
    # Layer 2: bf16 MXU input, f32 accumulate, f32 output store.
    o = jnp.dot(h.astype(jnp.bfloat16), w2_ref[...],
                preferred_element_type=jnp.float32)
    out_ref[...] = o + b2_ref[...]


@functools.partial(jax.jit, static_argnames=("block_batch",))
def dqn_forward(x, w1, b1, w2, b2, *, block_batch: int = 1024):
    """Run the fused DQN forward pass as a single batch-tiled Pallas call.

    x  : (batch, obs_size)     any float/int dtype (cast like `.float()`)
    w1 : (obs_size, hidden)    float32  (transpose of nn.Linear.weight)
    b1 : (1, hidden)           float32
    w2 : (hidden, n_actions)   float32
    b2 : (1, n_actions)        float32
    returns (batch, n_actions) float32
    """
    batch, obs_size = x.shape
    hidden = w1.shape[1]
    n_actions = w2.shape[1]

    # --- wrapper-side dtype prep only (no padding, no extra HBM passes) ---
    xf = x.astype(jnp.float32)                      # `.float()`; no-op for f32
    w1b = w1.astype(jnp.bfloat16)
    w2b = w2.astype(jnp.bfloat16)
    b1f = b1.astype(jnp.float32).reshape(1, hidden)
    b2f = b2.astype(jnp.float32).reshape(1, n_actions)

    # --- batch tile selection (no batch padding; last block may be partial) ---
    if batch <= 16:
        tb = batch                                  # full-extent block: always legal
    else:
        tb = min(block_batch, _round_up(batch, 16))  # multiple of 16 (bf16 sublanes)
        if batch >= 256:
            # v7x megacore: keep >= 2 grid steps so both TensorCores get work.
            half = _round_up(pl.cdiv(batch, 2), 16)
            tb = min(tb, max(128, half))
    grid = (pl.cdiv(batch, tb),)

    flops = 2 * batch * (obs_size * hidden + hidden * n_actions)
    bytes_accessed = (xf.size * 4 + w1b.size * 2 + w2b.size * 2
                      + b1f.size * 4 + b2f.size * 4 + batch * n_actions * 4)

    # Per-tile VMEM at tb=1024 is ~3 MiB (x/out blocks lane-padded to 128 plus
    # f32/bf16 hidden temporaries) — well under the scoped limit everywhere, so
    # no vmem_limit_bytes needed.  Revisit only if tb is pushed >= 4096 on v7x.
    return pl.pallas_call(
        _dqn_kernel,
        out_shape=jax.ShapeDtypeStruct((batch, n_actions), jnp.float32),
        grid_spec=pltpu.PrefetchScalarGridSpec(
            num_scalar_prefetch=0,
            grid=grid,
            in_specs=[
                pl.BlockSpec((tb, obs_size), lambda i: (i, 0)),       # x: batch-tiled
                pl.BlockSpec((obs_size, hidden), lambda i: (0, 0)),   # w1: resident
                pl.BlockSpec((1, hidden), lambda i: (0, 0)),          # b1: resident
                pl.BlockSpec((hidden, n_actions), lambda i: (0, 0)),  # w2: resident
                pl.BlockSpec((1, n_actions), lambda i: (0, 0)),       # b2: resident
            ],
            out_specs=pl.BlockSpec((tb, n_actions), lambda i: (i, 0)),
        ),
        compiler_params=pltpu.CompilerParams(
            dimension_semantics=("parallel",)),
        cost_estimate=pl.CostEstimate(
            flops=flops, transcendentals=0, bytes_accessed=bytes_accessed),
    )(xf, w1b, b1f, w2b, b2f)


def init_dqn_params(key, obs_size, n_actions, hidden_size=128):
    """Deterministic synthetic parameters matching nn.Linear shapes.

    PyTorch: Linear(obs, hidden).weight is (hidden, obs); we store the
    transpose (obs, hidden) so the kernel does x @ W directly.
    """
    k1, k2, k3, k4 = jax.random.split(key, 4)
    # Uniform(-1/sqrt(fan_in), 1/sqrt(fan_in)), same as torch.nn.Linear default.
    lim1 = 1.0 / jnp.sqrt(jnp.float32(obs_size))
    lim2 = 1.0 / jnp.sqrt(jnp.float32(hidden_size))
    w1 = jax.random.uniform(k1, (obs_size, hidden_size), jnp.float32, -lim1, lim1)
    b1 = jax.random.uniform(k2, (1, hidden_size), jnp.float32, -lim1, lim1)
    w2 = jax.random.uniform(k3, (hidden_size, n_actions), jnp.float32, -lim2, lim2)
    b2 = jax.random.uniform(k4, (1, n_actions), jnp.float32, -lim2, lim2)
    return w1, b1, w2, b2


if __name__ == "__main__":
    # Shapes consistent with the module's doctest: DQN(10, 5), hidden=128.
    obs_size, n_actions, hidden_size = 10, 5, 128

    key = jax.random.PRNGKey(0)
    k_params, k_x1, k_x2 = jax.random.split(key, 3)
    w1, b1, w2, b2 = init_dqn_params(k_params, obs_size, n_actions, hidden_size)

    def reference_bf16(x):
        # Mirrors the kernel's bf16-input / f32-accumulate math.
        xb = x.astype(jnp.bfloat16)
        h = jnp.maximum(
            jnp.dot(xb, w1.astype(jnp.bfloat16),
                    preferred_element_type=jnp.float32) + b1, 0.0)
        return jnp.dot(h.astype(jnp.bfloat16), w2.astype(jnp.bfloat16),
                       preferred_element_type=jnp.float32) + b2

    # 1) Tiny batch (doctest-scale): single full-extent block, grid=(1,).
    x_small = jax.random.normal(k_x1, (2, obs_size), dtype=jnp.float32)
    out_small = jax.block_until_ready(dqn_forward(x_small, w1, b1, w2, b2))
    assert out_small.shape == (2, n_actions), out_small.shape
    assert jnp.allclose(out_small, reference_bf16(x_small), atol=1e-3, rtol=1e-3), \
        "mismatch vs bf16 reference (small batch)"

    # 2) Ragged batch: exercises the multi-step grid with a partial last block
    #    (no batch padding, no output padding, no trailing slice).
    x_big = jax.random.normal(k_x2, (300, obs_size), dtype=jnp.float32)
    out_big = jax.block_until_ready(dqn_forward(x_big, w1, b1, w2, b2))
    assert out_big.shape == (300, n_actions), out_big.shape
    assert jnp.allclose(out_big, reference_bf16(x_big), atol=1e-3, rtol=1e-3), \
        "mismatch vs bf16 reference (ragged batch)"

    # 3) Loose sanity check against pure-f32 math (bf16 rounding tolerance).
    ref_f32 = jnp.maximum(x_small @ w1 + b1, 0.0) @ w2 + b2
    assert jnp.allclose(out_small, ref_f32, atol=3e-2, rtol=3e-2), \
        "drift vs f32 reference"

    print("KERNEL_OK")
</pallas_src>

<mosaic_0001>
module attributes {stable_mosaic.version = 11 : i64} {
  func.func @_dqn_kernel(%arg0: i32, %arg1: memref<2x10xf32, #tpu.memory_space<vmem>>, %arg2: memref<10x128xbf16, #tpu.memory_space<vmem>>, %arg3: memref<1x128xf32, #tpu.memory_space<vmem>>, %arg4: memref<128x5xbf16, #tpu.memory_space<vmem>>, %arg5: memref<1x5xf32, #tpu.memory_space<vmem>>, %arg6: memref<2x5xf32, #tpu.memory_space<vmem>>) attributes {dimension_semantics = [#tpu.dimension_semantics<parallel>], iteration_bounds = array<i64: 1>, scalar_prefetch = 0 : i64, scratch_operands = 0 : i64, tpu.core_type = #tpu.core_type<tc>, window_params = [{transform_indices = @transform_0, window_bounds = array<i64: 2, 10>}, {pipeline_mode = #tpu.pipeline_mode<synchronous>, transform_indices = @transform_1, window_bounds = array<i64: 10, 128>}, {pipeline_mode = #tpu.pipeline_mode<synchronous>, transform_indices = @transform_2, window_bounds = array<i64: 1, 128>}, {pipeline_mode = #tpu.pipeline_mode<synchronous>, transform_indices = @transform_3, window_bounds = array<i64: 128, 5>}, {pipeline_mode = #tpu.pipeline_mode<synchronous>, transform_indices = @transform_4, window_bounds = array<i64: 1, 5>}, {transform_indices = @transform_5, window_bounds = array<i64: 2, 5>}]} {
    %c0 = arith.constant 0 : index
    %c0_0 = arith.constant 0 : index
    %0 = vector.load %arg1[%c0, %c0_0] : memref<2x10xf32, #tpu.memory_space<vmem>>, vector<2x10xf32>
    %1 = arith.truncf %0 : vector<2x10xf32> to vector<2x10xbf16>
    %c0_1 = arith.constant 0 : index
    %c0_2 = arith.constant 0 : index
    %2 = vector.load %arg2[%c0_1, %c0_2] : memref<10x128xbf16, #tpu.memory_space<vmem>>, vector<10x128xbf16>
    %cst = arith.constant dense<0.000000e+00> : vector<2x128xf32>
    %3 = tpu.matmul %1, %2, %cst {dimension_numbers = #tpu.dot_dimension_numbers<[1], [0], [0], [1], [0, 0, 1, 1], [], []>} : vector<2x10xbf16>, vector<10x128xbf16>, vector<2x128xf32> -> vector<2x128xf32>
    %c0_3 = arith.constant 0 : index
    %c0_4 = arith.constant 0 : index
    %4 = vector.load %arg3[%c0_3, %c0_4] : memref<1x128xf32, #tpu.memory_space<vmem>>, vector<1x128xf32>
    %5 = vector.broadcast %4 : vector<1x128xf32> to vector<2x128xf32>
    %6 = arith.addf %3, %5 : vector<2x128xf32>
    %cst_5 = arith.constant 0.000000e+00 : f32
    %7 = vector.broadcast %cst_5 : f32 to vector<2x128xf32>
    %8 = arith.maximumf %6, %7 : vector<2x128xf32>
    %9 = arith.truncf %8 : vector<2x128xf32> to vector<2x128xbf16>
    %c0_6 = arith.constant 0 : index
    %c0_7 = arith.constant 0 : index
    %10 = vector.load %arg4[%c0_6, %c0_7] : memref<128x5xbf16, #tpu.memory_space<vmem>>, vector<128x5xbf16>
    %cst_8 = arith.constant dense<0.000000e+00> : vector<2x5xf32>
    %11 = tpu.matmul %9, %10, %cst_8 {dimension_numbers = #tpu.dot_dimension_numbers<[1], [0], [0], [1], [0, 0, 1, 1], [], []>} : vector<2x128xbf16>, vector<128x5xbf16>, vector<2x5xf32> -> vector<2x5xf32>
    %c0_9 = arith.constant 0 : index
    %c0_10 = arith.constant 0 : index
    %12 = vector.load %arg5[%c0_9, %c0_10] : memref<1x5xf32, #tpu.memory_space<vmem>>, vector<1x5xf32>
    %13 = vector.broadcast %12 : vector<1x5xf32> to vector<2x5xf32>
    %14 = arith.addf %11, %13 : vector<2x5xf32>
    %c0_11 = arith.constant 0 : index
    %c0_12 = arith.constant 0 : index
    %15 = vector.load %arg6[%c0_11, %c0_12] : memref<2x5xf32, #tpu.memory_space<vmem>>, vector<2x5xf32>
    tpu.vector_store %arg6[%c0_11, %c0_12], %14 {strides = array<i32>} : memref<2x5xf32, #tpu.memory_space<vmem>>, vector<2x5xf32>,
    return
  }
  func.func @transform_0(%arg0: i32) -> (i32, i32) {
    %c0_i32 = arith.constant 0 : i32
    %c0_i32_0 = arith.constant 0 : i32
    return %arg0, %c0_i32 : i32, i32
  }
  func.func @transform_1(%arg0: i32) -> (i32, i32) {
    %c0_i32 = arith.constant 0 : i32
    %c0_i32_0 = arith.constant 0 : i32
    %c0_i32_1 = arith.constant 0 : i32
    return %c0_i32, %c0_i32_0 : i32, i32
  }
  func.func @transform_2(%arg0: i32) -> (i32, i32) {
    %c0_i32 = arith.constant 0 : i32
    %c0_i32_0 = arith.constant 0 : i32
    %c0_i32_1 = arith.constant 0 : i32
    return %c0_i32, %c0_i32_0 : i32, i32
  }
  func.func @transform_3(%arg0: i32) -> (i32, i32) {
    %c0_i32 = arith.constant 0 : i32
    %c0_i32_0 = arith.constant 0 : i32
    %c0_i32_1 = arith.constant 0 : i32
    return %c0_i32, %c0_i32_0 : i32, i32
  }
  func.func @transform_4(%arg0: i32) -> (i32, i32) {
    %c0_i32 = arith.constant 0 : i32
    %c0_i32_0 = arith.constant 0 : i32
    %c0_i32_1 = arith.constant 0 : i32
    return %c0_i32, %c0_i32_0 : i32, i32
  }
  func.func @transform_5(%arg0: i32) -> (i32, i32) {
    %c0_i32 = arith.constant 0 : i32
    %c0_i32_0 = arith.constant 0 : i32
    return %arg0, %c0_i32 : i32, i32
  }
}

</mosaic_0001>

<bundles_post_ra>
// kernel: dqn_forward.1
= control target key start
LH: loop header
LB: loop body
LE: loop exit
PB: predicated region body
PF: predicated region fallthrough
CT: control target
= control target key end

     0   :  { %vm39_vm0 = vcmask 1044480   ;;  %vm35_vm1 = vcmask 80896   ;;  %s305_s0 = inlined_call_operand.vmem [shape: f32[2,10], index: 0, kind: input, shape index: {}]   ;;  %s306_s1 = inlined_call_operand.vmem [shape: bf16[10,128], index: 1, kind: input, shape index: {}]   ;;  %s307_s2 = inlined_call_operand.vmem [shape: f32[1,128], index: 2, kind: input, shape index: {}]   ;;  %s308_s3 = inlined_call_operand.vmem [shape: bf16[128,5], index: 3, kind: input, shape index: {}]   ;;  %s309_s4 = inlined_call_operand.vmem [shape: f32[1,5], index: 4, kind: input, shape index: {}]   ;;  %s310_s5 = inlined_call_operand.hbm [shape: f32[2,5], index: 5, kind: output, shape index: {}]  }
   0x1   :  { %v159_v0 = vld [vmem:[%s306_s1] sm:$0xf]  ;;  %v194_v1 = vld [vmem:[%s306_s1] sm:$0x10]  ;;  %v202_v4 = vld [vmem:[%s308_s3 + $0x38] sm:$0xff] }
   0x2   :  { %v160_v2 = vor.u32 %v194_v1, %v159_v0  ;;  %v22_v3 = vld [vmem:[%s305_s0] sm:$0x3]  ;;  %126 = vmatpush.bf16.msra.mxu1 %v202_v4  ;;  %v201_v7 = vld [vmem:[%s308_s3 + $0x30] sm:$0xff] }
   0x3   :  { %v23_v6 = vpack.c.bf16 %v22_v3, %v22_v3 }
   0x4   :  { %v41_v5 = vsel %vm39_vm0, %v160_v2, 0 }
   0x5   :  { %50 = vmatpush.bf16.msra.mxu0 %v41_v5 }
   0x6   :  { %10 = vsyncpa [#allocation3], 0  ;;  %127 = vmatpush.bf16.msra.mxu1 %v201_v7  ;;  %v200_v8 = vld [vmem:[%s308_s3 + $0x28] sm:$0xff]  ;;  %v199_v9 = vld [vmem:[%s308_s3 + $0x20] sm:$0xff]  ;;  %s232_s17 = smov [#allocation2]   ;;  %vm139_vm2 = vcmask 33792  }
   0x7   :  { %v198_v10 = vld [vmem:[%s308_s3 + $0x18] sm:$0xff]  ;;  %v197_v11 = vld [vmem:[%s308_s3 + $0x10] sm:$0xff]  ;;  %v196_v12 = vld [vmem:[%s308_s3 + $0x8] sm:$0xff]  ;;  %s146_s18 = sshll.u32 %s232_s17, 4  ;;  %s147_s18 = int_to_ptr.vmem [resolvable:$true] %s146_s18 }
   0x8   :  { %161 = vmatmul.msk.bf16.vlgmr.msra.gmra.mxu0 %vm35_vm1, %v23_v6  ;;  %v195_v13 = vld [vmem:[%s308_s3] sm:$0xff]  ;;  %s148_s3 = sshll.u32 %s310_s5, 4  ;;  %s149_s3 = int_to_ptr.hbm [resolvable:$true] %s148_s3 }
   0x9   :  { %v204_v14 = vld [vmem:[%s307_s2] ss:$0 sm:$0xff] }
   0xa   :  { %128 = vmatpush.bf16.msra.mxu1 %v200_v8  ;;  %v205_v20 = vld [vmem:[%s309_s4] ss:$0 sm:$0xff] }
   0xe   :  { %129 = vmatpush.bf16.msra.mxu1 %v199_v9 }
  0x12   :  { %130 = vmatpush.bf16.msra.mxu1 %v198_v10 }
  0x16   :  { %131 = vmatpush.bf16.msra.mxu1 %v197_v11 }
  0x1a   :  { %132 = vmatpush.bf16.msra.mxu1 %v196_v12 }
  0x1e   :  { %133 = vmatpush.bf16.msra.mxu1 %v195_v13 }
  0x85   :  { %v52_v15 = vpop.f32.mrf.mxu0 }
  0x86   :  { %v53_v16 = vadd.f32 %v204_v14, %v52_v15 }
  0x88   :  { %v56_v17 = vmax.f32 %v53_v16, 0.0 }
  0x8a   :  { %v57_v18 = vpack.c.bf16 %v56_v17, %v56_v17 }
  0x8c   :  { %134 = vmatmul.bf16.vlgmr.msra.gmra.mxu1 %v57_v18 }
  0x8d   :  { %v54_v19 = vpop.f32.mrf.mxu0 }
 0x109   :  { %v135_v21 = vpop.f32.mrf.mxu1 }
 0x10a   :  { %v136_v22 = vadd.f32 %v205_v20, %v135_v21 }
 0x10c   :  { %140 = vst.msk [vmem:[#allocation2] sm:$0x3] %vm139_vm2, %v136_v22 }
 0x10d   :  { %151 = dma.vmem_to_hbm [thread:$0]  %s147_s18, 32, %s149_s3, [#allocation3]  }
 0x111   :  { %v137_v23 = vpop.f32.mrf.mxu1 }
 0x112   :  { %230 = dma.done.wait [#allocation3], 32  }
 0x113   :  { %231 = vsyncadd [#allocation3], 4294967264 }
 0x114   :  { %156 = vsyncpa [#allocation3], 1 }

</bundles_post_ra>
